<compile_context>
chip_gen: v6e
topology: v6e:2x2x1
jax: 0.10.0
libtpu: 0.0.40
codegen_flags: <defaults>
</compile_context>

<pallas_src>
import jax
import jax.numpy as jnp
from jax.experimental import pallas as pl
from jax.experimental.pallas import tpu as pltpu

D_MODEL = 32
D_FF = 64
N_HEADS = 4
D_K = D_MODEL // N_HEADS
LN_EPS = 1e-12
NEG = -1024.0


def _layer_norm(x, gamma, beta, eps):
    mean = jnp.mean(x, axis=-1, keepdims=True)
    var = jnp.mean((x - mean) ** 2, axis=-1, keepdims=True)
    return (x - mean) * jax.lax.rsqrt(var + eps) * gamma + beta


def encoder_block_kernel(x_ref, mask_ref, ln_ref, wqkv_ref, bqkv_ref,
                         wo_ref, bo_ref, w1_ref, b1_ref, w2_ref, b2_ref,
                         out_ref, aw_ref):
    bt, t, d = x_ref.shape            # batch tile, time, d_model (static)
    h = aw_ref.shape[1]               # number of heads
    dk = d // h

    x = x_ref[...].astype(jnp.float32).reshape(bt * t, d)   # (bt*t, d)
    pad = mask_ref[...] == 0                                  # (bt, t, t) bool

    # ---- add_norm1: pre-LayerNorm + multi-head self-attention + residual ----
    xn = _layer_norm(x, ln_ref[0:1, :], ln_ref[1:2, :], LN_EPS)

    # Fused QKV projection; attention scale is pre-folded into the Q columns.
    qkv = jnp.dot(xn, wqkv_ref[...],
                  preferred_element_type=jnp.float32) + bqkv_ref[...]  # (bt*t, 3d)

    e_heads = []
    v_heads = []
    for hh in range(h):               # static unroll; only the dk-lane slices
        q_h = qkv[:, hh * dk:(hh + 1) * dk].reshape(bt, t, dk)
        k_h = qkv[:, d + hh * dk: d + (hh + 1) * dk].reshape(bt, t, dk)
        v_h = qkv[:, 2 * d + hh * dk: 2 * d + (hh + 1) * dk].reshape(bt, t, dk)
        e_heads.append(jnp.einsum('bqd,bkd->bqk', q_h, k_h,
                                  preferred_element_type=jnp.float32))
        v_heads.append(v_h)

    e = jnp.stack(e_heads, axis=1)                       # (bt, h, t, t)
    # masked_fill_(mask == 0, -1024): one compare, one select over all heads.
    e = jnp.where(pad[:, None, :, :], NEG, e)
    e_max = jnp.max(e, axis=-1, keepdims=True)
    p = jnp.exp(e - e_max)
    aw = p / jnp.sum(p, axis=-1, keepdims=True)          # exact div (tolerance)
    aw_ref[...] = aw.astype(aw_ref.dtype)                # single store

    cv = jnp.concatenate(
        [jnp.einsum('bqk,bkd->bqd', aw[:, hh], v_heads[hh],
                    preferred_element_type=jnp.float32) for hh in range(h)],
        axis=-1).reshape(bt * t, d)

    attn = jnp.dot(cv, wo_ref[...],
                   preferred_element_type=jnp.float32) + bo_ref[...]
    x = x + attn                       # residual (dropout == identity in eval)

    # ---- add_norm2: pre-LayerNorm + position-wise feed-forward + residual ----
    xn2 = _layer_norm(x, ln_ref[2:3, :], ln_ref[3:4, :], LN_EPS)
    h1 = jnp.maximum(
        jnp.dot(xn2, w1_ref[...], preferred_element_type=jnp.float32) + b1_ref[...],
        0.0)
    ff = jnp.dot(h1, w2_ref[...], preferred_element_type=jnp.float32) + b2_ref[...]
    x = x + ff

    out_ref[...] = x.reshape(bt, t, d).astype(out_ref.dtype)


def transformer_encoder_block(xs, mask, params):
    (ln1_g, ln1_b, wq, bq, wk, bk, wv, bv, wo, bo,
     ln2_g, ln2_b, w1, b1, w2, b2) = params
    B, T, D = xs.shape
    assert D == D_MODEL
    H = N_HEADS
    DK = D // H
    scale = 1.0 / (DK ** 0.5)

    # Static parameter packing (free at runtime).
    wqkv = jnp.concatenate([wq * scale, wk, wv], axis=1)        # (D, 3D)
    bqkv = jnp.concatenate([bq * scale, bk, bv], axis=1)        # (1, 3D)
    ln = jnp.concatenate([ln1_g, ln1_b, ln2_g, ln2_b], axis=0)  # (4, D)

    # 2-way batch split keeps both v7x TensorCores busy ("parallel" axis);
    # on single-TC chips it is one extra ~0.35 us grid step (negligible).
    n_split = 2 if (B % 2 == 0 and B >= 2) else 1
    bt = B // n_split

    def _const(shape):
        return pl.BlockSpec(shape, lambda i, n=len(shape): (0,) * n)

    in_specs = [
        pl.BlockSpec((bt, T, D), lambda i: (i, 0, 0)),
        pl.BlockSpec((bt, T, T), lambda i: (i, 0, 0)),
        _const(ln.shape), _const(wqkv.shape), _const(bqkv.shape),
        _const(wo.shape), _const(bo.shape),
        _const(w1.shape), _const(b1.shape),
        _const(w2.shape), _const(b2.shape),
    ]
    out_specs = [
        pl.BlockSpec((bt, T, D), lambda i: (i, 0, 0)),
        pl.BlockSpec((bt, H, T, T), lambda i: (i, 0, 0, 0)),
    ]
    out_shape = [
        jax.ShapeDtypeStruct((B, T, D), xs.dtype),
        jax.ShapeDtypeStruct((B, H, T, T), jnp.float32),
    ]
    return pl.pallas_call(
        encoder_block_kernel,
        grid=(n_split,),
        in_specs=in_specs,
        out_specs=out_specs,
        out_shape=out_shape,
        compiler_params=pltpu.CompilerParams(
            dimension_semantics=("parallel",)),
    )(xs, mask, ln, wqkv, bqkv, wo, bo, w1, b1, w2, b2)


def reference(xs, mask, params):
    """Pure-JAX reference identical to the PyTorch eval-mode forward."""
    (ln1_g, ln1_b, wq, bq, wk, bk, wv, bv, wo, bo,
     ln2_g, ln2_b, w1, b1, w2, b2) = params
    B, T, D = xs.shape

    def ln(x, g, b):
        m = x.mean(-1, keepdims=True)
        v = ((x - m) ** 2).mean(-1, keepdims=True)
        return (x - m) / jnp.sqrt(v + LN_EPS) * g + b

    xn = ln(xs, ln1_g, ln1_b)
    q = (xn @ wq + bq).reshape(B, T, N_HEADS, D_K).transpose(0, 2, 1, 3)
    k = (xn @ wk + bk).reshape(B, T, N_HEADS, D_K).transpose(0, 2, 1, 3)
    v = (xn @ wv + bv).reshape(B, T, N_HEADS, D_K).transpose(0, 2, 1, 3)
    e = jnp.einsum("bhqd,bhkd->bhqk", q, k) / (D_K ** 0.5)
    e = jnp.where(mask[:, None] == 0, NEG, e)
    aw = jax.nn.softmax(e, axis=-1)
    cv = jnp.einsum("bhqk,bhkd->bhqd", aw, v).transpose(0, 2, 1, 3).reshape(B, T, D)
    x = xs + (cv @ wo + bo)
    xn2 = ln(x, ln2_g, ln2_b)
    ff = jnp.maximum(xn2 @ w1 + b1, 0.0) @ w2 + b2
    return x + ff, aw


def init_params(key):
    ks = jax.random.split(key, 8)
    s = 0.1
    ln1_g = jnp.ones((1, D_MODEL), jnp.float32)
    ln1_b = jnp.zeros((1, D_MODEL), jnp.float32)
    ln2_g = jnp.ones((1, D_MODEL), jnp.float32)
    ln2_b = jnp.zeros((1, D_MODEL), jnp.float32)
    wq = jax.random.normal(ks[0], (D_MODEL, D_MODEL), jnp.float32) * s
    wk = jax.random.normal(ks[1], (D_MODEL, D_MODEL), jnp.float32) * s
    wv = jax.random.normal(ks[2], (D_MODEL, D_MODEL), jnp.float32) * s
    wo = jax.random.normal(ks[3], (D_MODEL, D_MODEL), jnp.float32) * s
    w1 = jax.random.normal(ks[4], (D_MODEL, D_FF), jnp.float32) * s
    w2 = jax.random.normal(ks[5], (D_FF, D_MODEL), jnp.float32) * s
    bq = jax.random.normal(ks[6], (1, D_MODEL), jnp.float32) * s
    bk = jnp.zeros((1, D_MODEL), jnp.float32)
    bv = jax.random.normal(ks[7], (1, D_MODEL), jnp.float32) * s
    bo = jnp.zeros((1, D_MODEL), jnp.float32)
    b1 = jnp.zeros((1, D_FF), jnp.float32)
    b2 = jnp.zeros((1, D_MODEL), jnp.float32)
    return (ln1_g, ln1_b, wq, bq, wk, bk, wv, bv, wo, bo,
            ln2_g, ln2_b, w1, b1, w2, b2)


if __name__ == "__main__":
    key = jax.random.PRNGKey(0)
    k_x, k_p = jax.random.split(key)

    B, T = 2, 8
    xs = jax.random.normal(k_x, (B, T, D_MODEL), jnp.float32)
    lengths = jnp.array([8, 5], jnp.int32)
    valid = (jnp.arange(T)[None, :] < lengths[:, None]).astype(jnp.int32)     # (B, T)
    mask = jnp.broadcast_to(valid[:, None, :], (B, T, T)).astype(jnp.int32)   # (B, T, T)

    params = init_params(k_p)

    out, aw = transformer_encoder_block(xs, mask, params)
    out, aw = jax.block_until_ready(out), jax.block_until_ready(aw)

    ref_out, ref_aw = reference(xs, mask, params)
    assert out.shape == (B, T, D_MODEL) and aw.shape == (B, N_HEADS, T, T)
    assert jnp.allclose(out, ref_out, atol=1e-4, rtol=1e-4)
    assert jnp.allclose(aw, ref_aw, atol=1e-5, rtol=1e-5)

    print("KERNEL_OK")
</pallas_src>

<mosaic_0001>
module attributes {stable_mosaic.version = 11 : i64} {
  func.func @encoder_block_kernel(%arg0: i32, %arg1: memref<1x8x32xf32, #tpu.memory_space<vmem>>, %arg2: memref<1x8x8xi32, #tpu.memory_space<vmem>>, %arg3: memref<4x32xf32, #tpu.memory_space<vmem>>, %arg4: memref<32x96xf32, #tpu.memory_space<vmem>>, %arg5: memref<1x96xf32, #tpu.memory_space<vmem>>, %arg6: memref<32x32xf32, #tpu.memory_space<vmem>>, %arg7: memref<1x32xf32, #tpu.memory_space<vmem>>, %arg8: memref<32x64xf32, #tpu.memory_space<vmem>>, %arg9: memref<1x64xf32, #tpu.memory_space<vmem>>, %arg10: memref<64x32xf32, #tpu.memory_space<vmem>>, %arg11: memref<1x32xf32, #tpu.memory_space<vmem>>, %arg12: memref<1x8x32xf32, #tpu.memory_space<vmem>>, %arg13: memref<1x4x8x8xf32, #tpu.memory_space<vmem>>) attributes {dimension_semantics = [#tpu.dimension_semantics<parallel>], iteration_bounds = array<i64: 2>, scalar_prefetch = 0 : i64, scratch_operands = 0 : i64, tpu.core_type = #tpu.core_type<tc>, window_params = [{transform_indices = @transform_0, window_bounds = array<i64: 1, 8, 32>}, {transform_indices = @transform_1, window_bounds = array<i64: 1, 8, 8>}, {pipeline_mode = #tpu.pipeline_mode<synchronous>, transform_indices = @transform_2, window_bounds = array<i64: 4, 32>}, {pipeline_mode = #tpu.pipeline_mode<synchronous>, transform_indices = @transform_3, window_bounds = array<i64: 32, 96>}, {pipeline_mode = #tpu.pipeline_mode<synchronous>, transform_indices = @transform_4, window_bounds = array<i64: 1, 96>}, {pipeline_mode = #tpu.pipeline_mode<synchronous>, transform_indices = @transform_5, window_bounds = array<i64: 32, 32>}, {pipeline_mode = #tpu.pipeline_mode<synchronous>, transform_indices = @transform_6, window_bounds = array<i64: 1, 32>}, {pipeline_mode = #tpu.pipeline_mode<synchronous>, transform_indices = @transform_7, window_bounds = array<i64: 32, 64>}, {pipeline_mode = #tpu.pipeline_mode<synchronous>, transform_indices = @transform_8, window_bounds = array<i64: 1, 64>}, {pipeline_mode = #tpu.pipeline_mode<synchronous>, transform_indices = @transform_9, window_bounds = array<i64: 64, 32>}, {pipeline_mode = #tpu.pipeline_mode<synchronous>, transform_indices = @transform_10, window_bounds = array<i64: 1, 32>}, {transform_indices = @transform_11, window_bounds = array<i64: 1, 8, 32>}, {transform_indices = @transform_12, window_bounds = array<i64: 1, 4, 8, 8>}]} {
    %c0 = arith.constant 0 : index
    %c0_0 = arith.constant 0 : index
    %c0_1 = arith.constant 0 : index
    %0 = vector.load %arg1[%c0, %c0_0, %c0_1] : memref<1x8x32xf32, #tpu.memory_space<vmem>>, vector<1x8x32xf32>
    %1 = vector.shape_cast %0 : vector<1x8x32xf32> to vector<8x32xf32>
    %c0_2 = arith.constant 0 : index
    %c0_3 = arith.constant 0 : index
    %c0_4 = arith.constant 0 : index
    %2 = vector.load %arg2[%c0_2, %c0_3, %c0_4] : memref<1x8x8xi32, #tpu.memory_space<vmem>>, vector<1x8x8xi32>
    %c0_i32 = arith.constant 0 : i32
    %3 = vector.broadcast %c0_i32 : i32 to vector<1x8x8xi32>
    %4 = arith.cmpi eq, %2, %3 : vector<1x8x8xi32>
    %c0_5 = arith.constant 0 : index
    %c0_6 = arith.constant 0 : index
    %5 = vector.load %arg3[%c0_5, %c0_6] : memref<4x32xf32, #tpu.memory_space<vmem>>, vector<1x32xf32>
    %c1 = arith.constant 1 : index
    %c0_7 = arith.constant 0 : index
    %6 = vector.load %arg3[%c1, %c0_7] : memref<4x32xf32, #tpu.memory_space<vmem>>, vector<1x32xf32>
    %cst = arith.constant dense<0.000000e+00> : vector<8xf32>
    %7 = vector.multi_reduction <add>, %1, %cst [1] : vector<8x32xf32> to vector<8xf32>
    %8 = vector.shape_cast %7 : vector<8xf32> to vector<8x1xf32>
    %cst_8 = arith.constant 3.200000e+01 : f32
    %9 = vector.broadcast %cst_8 : f32 to vector<8x1xf32>
    %10 = arith.divf %8, %9 : vector<8x1xf32>
    %11 = vector.broadcast %10 : vector<8x1xf32> to vector<8x32xf32>
    %12 = arith.subf %1, %11 : vector<8x32xf32>
    %13 = arith.mulf %12, %12 : vector<8x32xf32>
    %cst_9 = arith.constant dense<0.000000e+00> : vector<8xf32>
    %14 = vector.multi_reduction <add>, %13, %cst_9 [1] : vector<8x32xf32> to vector<8xf32>
    %15 = vector.shape_cast %14 : vector<8xf32> to vector<8x1xf32>
    %cst_10 = arith.constant 3.200000e+01 : f32
    %16 = vector.broadcast %cst_10 : f32 to vector<8x1xf32>
    %17 = arith.divf %15, %16 : vector<8x1xf32>
    %18 = vector.broadcast %10 : vector<8x1xf32> to vector<8x32xf32>
    %19 = arith.subf %1, %18 : vector<8x32xf32>
    %cst_11 = arith.constant 9.99999996E-13 : f32
    %20 = vector.broadcast %cst_11 : f32 to vector<8x1xf32>
    %21 = arith.addf %17, %20 : vector<8x1xf32>
    %22 = math.rsqrt %21 : vector<8x1xf32>
    %23 = vector.broadcast %22 : vector<8x1xf32> to vector<8x32xf32>
    %24 = arith.mulf %19, %23 : vector<8x32xf32>
    %25 = vector.broadcast %5 : vector<1x32xf32> to vector<8x32xf32>
    %26 = arith.mulf %24, %25 : vector<8x32xf32>
    %27 = vector.broadcast %6 : vector<1x32xf32> to vector<8x32xf32>
    %28 = arith.addf %26, %27 : vector<8x32xf32>
    %c0_12 = arith.constant 0 : index
    %c0_13 = arith.constant 0 : index
    %29 = vector.load %arg4[%c0_12, %c0_13] : memref<32x96xf32, #tpu.memory_space<vmem>>, vector<32x96xf32>
    %cst_14 = arith.constant dense<0.000000e+00> : vector<8x96xf32>
    %30 = tpu.matmul %28, %29, %cst_14 {dimension_numbers = #tpu.dot_dimension_numbers<[1], [0], [0], [1], [0, 0, 1, 1], [], []>} : vector<8x32xf32>, vector<32x96xf32>, vector<8x96xf32> -> vector<8x96xf32>
    %c0_15 = arith.constant 0 : index
    %c0_16 = arith.constant 0 : index
    %31 = vector.load %arg5[%c0_15, %c0_16] : memref<1x96xf32, #tpu.memory_space<vmem>>, vector<1x96xf32>
    %32 = vector.broadcast %31 : vector<1x96xf32> to vector<8x96xf32>
    %33 = arith.addf %30, %32 : vector<8x96xf32>
    %34 = vector.extract_strided_slice %33 {offsets = [0, 0], sizes = [8, 8], strides = [1, 1]} : vector<8x96xf32> to vector<8x8xf32>
    %35 = vector.shape_cast %34 : vector<8x8xf32> to vector<1x8x8xf32>
    %36 = vector.extract_strided_slice %33 {offsets = [0, 32], sizes = [8, 8], strides = [1, 1]} : vector<8x96xf32> to vector<8x8xf32>
    %37 = vector.shape_cast %36 : vector<8x8xf32> to vector<1x8x8xf32>
    %38 = vector.extract_strided_slice %33 {offsets = [0, 64], sizes = [8, 8], strides = [1, 1]} : vector<8x96xf32> to vector<8x8xf32>
    %39 = vector.shape_cast %38 : vector<8x8xf32> to vector<1x8x8xf32>
    "tpu.trace_start"() <{level = 10 : i32, message = "bqd,bkd->bqk"}> : () -> ()
    %cst_17 = arith.constant dense<0.000000e+00> : vector<1x8x8xf32>
    %40 = tpu.matmul %35, %37, %cst_17 {dimension_numbers = #tpu.dot_dimension_numbers<[2], [2], [1], [1], [0, 0, 0, 1, 1, 1], [0], [0]>} : vector<1x8x8xf32>, vector<1x8x8xf32>, vector<1x8x8xf32> -> vector<1x8x8xf32>
    "tpu.trace_stop"() : () -> ()
    %41 = vector.extract_strided_slice %33 {offsets = [0, 8], sizes = [8, 8], strides = [1, 1]} : vector<8x96xf32> to vector<8x8xf32>
    %42 = vector.shape_cast %41 : vector<8x8xf32> to vector<1x8x8xf32>
    %43 = vector.extract_strided_slice %33 {offsets = [0, 40], sizes = [8, 8], strides = [1, 1]} : vector<8x96xf32> to vector<8x8xf32>
    %44 = vector.shape_cast %43 : vector<8x8xf32> to vector<1x8x8xf32>
    %45 = vector.extract_strided_slice %33 {offsets = [0, 72], sizes = [8, 8], strides = [1, 1]} : vector<8x96xf32> to vector<8x8xf32>
    %46 = vector.shape_cast %45 : vector<8x8xf32> to vector<1x8x8xf32>
    "tpu.trace_start"() <{level = 10 : i32, message = "bqd,bkd->bqk"}> : () -> ()
    %cst_18 = arith.constant dense<0.000000e+00> : vector<1x8x8xf32>
    %47 = tpu.matmul %42, %44, %cst_18 {dimension_numbers = #tpu.dot_dimension_numbers<[2], [2], [1], [1], [0, 0, 0, 1, 1, 1], [0], [0]>} : vector<1x8x8xf32>, vector<1x8x8xf32>, vector<1x8x8xf32> -> vector<1x8x8xf32>
    "tpu.trace_stop"() : () -> ()
    %48 = vector.extract_strided_slice %33 {offsets = [0, 16], sizes = [8, 8], strides = [1, 1]} : vector<8x96xf32> to vector<8x8xf32>
    %49 = vector.shape_cast %48 : vector<8x8xf32> to vector<1x8x8xf32>
    %50 = vector.extract_strided_slice %33 {offsets = [0, 48], sizes = [8, 8], strides = [1, 1]} : vector<8x96xf32> to vector<8x8xf32>
    %51 = vector.shape_cast %50 : vector<8x8xf32> to vector<1x8x8xf32>
    %52 = vector.extract_strided_slice %33 {offsets = [0, 80], sizes = [8, 8], strides = [1, 1]} : vector<8x96xf32> to vector<8x8xf32>
    %53 = vector.shape_cast %52 : vector<8x8xf32> to vector<1x8x8xf32>
    "tpu.trace_start"() <{level = 10 : i32, message = "bqd,bkd->bqk"}> : () -> ()
    %cst_19 = arith.constant dense<0.000000e+00> : vector<1x8x8xf32>
    %54 = tpu.matmul %49, %51, %cst_19 {dimension_numbers = #tpu.dot_dimension_numbers<[2], [2], [1], [1], [0, 0, 0, 1, 1, 1], [0], [0]>} : vector<1x8x8xf32>, vector<1x8x8xf32>, vector<1x8x8xf32> -> vector<1x8x8xf32>
    "tpu.trace_stop"() : () -> ()
    %55 = vector.extract_strided_slice %33 {offsets = [0, 24], sizes = [8, 8], strides = [1, 1]} : vector<8x96xf32> to vector<8x8xf32>
    %56 = vector.shape_cast %55 : vector<8x8xf32> to vector<1x8x8xf32>
    %57 = vector.extract_strided_slice %33 {offsets = [0, 56], sizes = [8, 8], strides = [1, 1]} : vector<8x96xf32> to vector<8x8xf32>
    %58 = vector.shape_cast %57 : vector<8x8xf32> to vector<1x8x8xf32>
    %59 = vector.extract_strided_slice %33 {offsets = [0, 88], sizes = [8, 8], strides = [1, 1]} : vector<8x96xf32> to vector<8x8xf32>
    %60 = vector.shape_cast %59 : vector<8x8xf32> to vector<1x8x8xf32>
    "tpu.trace_start"() <{level = 10 : i32, message = "bqd,bkd->bqk"}> : () -> ()
    %cst_20 = arith.constant dense<0.000000e+00> : vector<1x8x8xf32>
    %61 = tpu.matmul %56, %58, %cst_20 {dimension_numbers = #tpu.dot_dimension_numbers<[2], [2], [1], [1], [0, 0, 0, 1, 1, 1], [0], [0]>} : vector<1x8x8xf32>, vector<1x8x8xf32>, vector<1x8x8xf32> -> vector<1x8x8xf32>
    "tpu.trace_stop"() : () -> ()
    %62 = vector.shape_cast %40 : vector<1x8x8xf32> to vector<1x1x8x8xf32>
    %63 = vector.shape_cast %47 : vector<1x8x8xf32> to vector<1x1x8x8xf32>
    %64 = vector.shape_cast %54 : vector<1x8x8xf32> to vector<1x1x8x8xf32>
    %65 = vector.shape_cast %61 : vector<1x8x8xf32> to vector<1x1x8x8xf32>
    %66 = tpu.concatenate %62, %63, %64, %65 in 1 : vector<1x1x8x8xf32>, vector<1x1x8x8xf32>, vector<1x1x8x8xf32>, vector<1x1x8x8xf32> -> vector<1x4x8x8xf32>
    %67 = vector.shape_cast %4 : vector<1x8x8xi1> to vector<1x1x8x8xi1>
    %cst_21 = arith.constant -1.024000e+03 : f32
    %68 = vector.shape_cast %67 : vector<1x1x8x8xi1> to vector<1x1x8x8xi1>
    %69 = vector.broadcast %68 : vector<1x1x8x8xi1> to vector<1x4x8x8xi1>
    %70 = vector.broadcast %cst_21 : f32 to vector<1x4x8x8xf32>
    %71 = arith.select %69, %70, %66 : vector<1x4x8x8xi1>, vector<1x4x8x8xf32>
    %cst_22 = arith.constant dense<0xFF800000> : vector<1x4x8xf32>
    %72 = vector.multi_reduction <maximumf>, %71, %cst_22 [3] : vector<1x4x8x8xf32> to vector<1x4x8xf32>
    %73 = vector.shape_cast %72 : vector<1x4x8xf32> to vector<1x4x8x1xf32>
    %74 = vector.broadcast %73 : vector<1x4x8x1xf32> to vector<1x4x8x8xf32>
    %75 = arith.subf %71, %74 : vector<1x4x8x8xf32>
    %76 = math.exp %75 : vector<1x4x8x8xf32>
    %cst_23 = arith.constant dense<0.000000e+00> : vector<1x4x8xf32>
    %77 = vector.multi_reduction <add>, %76, %cst_23 [3] : vector<1x4x8x8xf32> to vector<1x4x8xf32>
    %78 = vector.shape_cast %77 : vector<1x4x8xf32> to vector<1x4x8x1xf32>
    %79 = vector.broadcast %78 : vector<1x4x8x1xf32> to vector<1x4x8x8xf32>
    %80 = arith.divf %76, %79 : vector<1x4x8x8xf32>
    %c0_24 = arith.constant 0 : index
    %c0_25 = arith.constant 0 : index
    %c0_26 = arith.constant 0 : index
    %c0_27 = arith.constant 0 : index
    %81 = vector.load %arg13[%c0_24, %c0_25, %c0_26, %c0_27] : memref<1x4x8x8xf32, #tpu.memory_space<vmem>>, vector<1x4x8x8xf32>
    tpu.vector_store %arg13[%c0_24, %c0_25, %c0_26, %c0_27], %80 {strides = array<i32>} : memref<1x4x8x8xf32, #tpu.memory_space<vmem>>, vector<1x4x8x8xf32>,
    %82 = vector.extract_strided_slice %80 {offsets = [0, 0, 0, 0], sizes = [1, 1, 8, 8], strides = [1, 1, 1, 1]} : vector<1x4x8x8xf32> to vector<1x1x8x8xf32>
    %83 = vector.shape_cast %82 : vector<1x1x8x8xf32> to vector<1x8x8xf32>
    "tpu.trace_start"() <{level = 10 : i32, message = "bqk,bkd->bqd"}> : () -> ()
    %cst_28 = arith.constant dense<0.000000e+00> : vector<1x8x8xf32>
    %84 = tpu.matmul %83, %39, %cst_28 {dimension_numbers = #tpu.dot_dimension_numbers<[2], [1], [1], [2], [0, 0, 0, 1, 1, 2], [0], [0]>} : vector<1x8x8xf32>, vector<1x8x8xf32>, vector<1x8x8xf32> -> vector<1x8x8xf32>
    "tpu.trace_stop"() : () -> ()
    %85 = vector.extract_strided_slice %80 {offsets = [0, 1, 0, 0], sizes = [1, 1, 8, 8], strides = [1, 1, 1, 1]} : vector<1x4x8x8xf32> to vector<1x1x8x8xf32>
    %86 = vector.shape_cast %85 : vector<1x1x8x8xf32> to vector<1x8x8xf32>
    "tpu.trace_start"() <{level = 10 : i32, message = "bqk,bkd->bqd"}> : () -> ()
    %cst_29 = arith.constant dense<0.000000e+00> : vector<1x8x8xf32>
    %87 = tpu.matmul %86, %46, %cst_29 {dimension_numbers = #tpu.dot_dimension_numbers<[2], [1], [1], [2], [0, 0, 0, 1, 1, 2], [0], [0]>} : vector<1x8x8xf32>, vector<1x8x8xf32>, vector<1x8x8xf32> -> vector<1x8x8xf32>
    "tpu.trace_stop"() : () -> ()
    %88 = vector.extract_strided_slice %80 {offsets = [0, 2, 0, 0], sizes = [1, 1, 8, 8], strides = [1, 1, 1, 1]} : vector<1x4x8x8xf32> to vector<1x1x8x8xf32>
    %89 = vector.shape_cast %88 : vector<1x1x8x8xf32> to vector<1x8x8xf32>
    "tpu.trace_start"() <{level = 10 : i32, message = "bqk,bkd->bqd"}> : () -> ()
    %cst_30 = arith.constant dense<0.000000e+00> : vector<1x8x8xf32>
    %90 = tpu.matmul %89, %53, %cst_30 {dimension_numbers = #tpu.dot_dimension_numbers<[2], [1], [1], [2], [0, 0, 0, 1, 1, 2], [0], [0]>} : vector<1x8x8xf32>, vector<1x8x8xf32>, vector<1x8x8xf32> -> vector<1x8x8xf32>
    "tpu.trace_stop"() : () -> ()
    %91 = vector.extract_strided_slice %80 {offsets = [0, 3, 0, 0], sizes = [1, 1, 8, 8], strides = [1, 1, 1, 1]} : vector<1x4x8x8xf32> to vector<1x1x8x8xf32>
    %92 = vector.shape_cast %91 : vector<1x1x8x8xf32> to vector<1x8x8xf32>
    "tpu.trace_start"() <{level = 10 : i32, message = "bqk,bkd->bqd"}> : () -> ()
    %cst_31 = arith.constant dense<0.000000e+00> : vector<1x8x8xf32>
    %93 = tpu.matmul %92, %60, %cst_31 {dimension_numbers = #tpu.dot_dimension_numbers<[2], [1], [1], [2], [0, 0, 0, 1, 1, 2], [0], [0]>} : vector<1x8x8xf32>, vector<1x8x8xf32>, vector<1x8x8xf32> -> vector<1x8x8xf32>
    "tpu.trace_stop"() : () -> ()
    %94 = tpu.concatenate %84, %87, %90, %93 in 2 : vector<1x8x8xf32>, vector<1x8x8xf32>, vector<1x8x8xf32>, vector<1x8x8xf32> -> vector<1x8x32xf32>
    %95 = vector.shape_cast %94 : vector<1x8x32xf32> to vector<8x32xf32>
    %c0_32 = arith.constant 0 : index
    %c0_33 = arith.constant 0 : index
    %96 = vector.load %arg6[%c0_32, %c0_33] : memref<32x32xf32, #tpu.memory_space<vmem>>, vector<32x32xf32>
    %cst_34 = arith.constant dense<0.000000e+00> : vector<8x32xf32>
    %97 = tpu.matmul %95, %96, %cst_34 {dimension_numbers = #tpu.dot_dimension_numbers<[1], [0], [0], [1], [0, 0, 1, 1], [], []>} : vector<8x32xf32>, vector<32x32xf32>, vector<8x32xf32> -> vector<8x32xf32>
    %c0_35 = arith.constant 0 : index
    %c0_36 = arith.constant 0 : index
    %98 = vector.load %arg7[%c0_35, %c0_36] : memref<1x32xf32, #tpu.memory_space<vmem>>, vector<1x32xf32>
    %99 = vector.broadcast %98 : vector<1x32xf32> to vector<8x32xf32>
    %100 = arith.addf %97, %99 : vector<8x32xf32>
    %101 = arith.addf %1, %100 : vector<8x32xf32>
    %c2 = arith.constant 2 : index
    %c0_37 = arith.constant 0 : index
    %102 = vector.load %arg3[%c2, %c0_37] : memref<4x32xf32, #tpu.memory_space<vmem>>, vector<1x32xf32>
    %c3 = arith.constant 3 : index
    %c0_38 = arith.constant 0 : index
    %103 = vector.load %arg3[%c3, %c0_38] : memref<4x32xf32, #tpu.memory_space<vmem>>, vector<1x32xf32>
    %cst_39 = arith.constant dense<0.000000e+00> : vector<8xf32>
    %104 = vector.multi_reduction <add>, %101, %cst_39 [1] : vector<8x32xf32> to vector<8xf32>
    %105 = vector.shape_cast %104 : vector<8xf32> to vector<8x1xf32>
    %cst_40 = arith.constant 3.200000e+01 : f32
    %106 = vector.broadcast %cst_40 : f32 to vector<8x1xf32>
    %107 = arith.divf %105, %106 : vector<8x1xf32>
    %108 = vector.broadcast %107 : vector<8x1xf32> to vector<8x32xf32>
    %109 = arith.subf %101, %108 : vector<8x32xf32>
    %110 = arith.mulf %109, %109 : vector<8x32xf32>
    %cst_41 = arith.constant dense<0.000000e+00> : vector<8xf32>
    %111 = vector.multi_reduction <add>, %110, %cst_41 [1] : vector<8x32xf32> to vector<8xf32>
    %112 = vector.shape_cast %111 : vector<8xf32> to vector<8x1xf32>
    %cst_42 = arith.constant 3.200000e+01 : f32
    %113 = vector.broadcast %cst_42 : f32 to vector<8x1xf32>
    %114 = arith.divf %112, %113 : vector<8x1xf32>
    %115 = vector.broadcast %107 : vector<8x1xf32> to vector<8x32xf32>
    %116 = arith.subf %101, %115 : vector<8x32xf32>
    %cst_43 = arith.constant 9.99999996E-13 : f32
    %117 = vector.broadcast %cst_43 : f32 to vector<8x1xf32>
    %118 = arith.addf %114, %117 : vector<8x1xf32>
    %119 = math.rsqrt %118 : vector<8x1xf32>
    %120 = vector.broadcast %119 : vector<8x1xf32> to vector<8x32xf32>
    %121 = arith.mulf %116, %120 : vector<8x32xf32>
    %122 = vector.broadcast %102 : vector<1x32xf32> to vector<8x32xf32>
    %123 = arith.mulf %121, %122 : vector<8x32xf32>
    %124 = vector.broadcast %103 : vector<1x32xf32> to vector<8x32xf32>
    %125 = arith.addf %123, %124 : vector<8x32xf32>
    %c0_44 = arith.constant 0 : index
    %c0_45 = arith.constant 0 : index
    %126 = vector.load %arg8[%c0_44, %c0_45] : memref<32x64xf32, #tpu.memory_space<vmem>>, vector<32x64xf32>
    %cst_46 = arith.constant dense<0.000000e+00> : vector<8x64xf32>
    %127 = tpu.matmul %125, %126, %cst_46 {dimension_numbers = #tpu.dot_dimension_numbers<[1], [0], [0], [1], [0, 0, 1, 1], [], []>} : vector<8x32xf32>, vector<32x64xf32>, vector<8x64xf32> -> vector<8x64xf32>
    %c0_47 = arith.constant 0 : index
    %c0_48 = arith.constant 0 : index
    %128 = vector.load %arg9[%c0_47, %c0_48] : memref<1x64xf32, #tpu.memory_space<vmem>>, vector<1x64xf32>
    %129 = vector.broadcast %128 : vector<1x64xf32> to vector<8x64xf32>
    %130 = arith.addf %127, %129 : vector<8x64xf32>
    %cst_49 = arith.constant 0.000000e+00 : f32
    %131 = vector.broadcast %cst_49 : f32 to vector<8x64xf32>
    %132 = arith.maximumf %130, %131 : vector<8x64xf32>
    %c0_50 = arith.constant 0 : index
    %c0_51 = arith.constant 0 : index
    %133 = vector.load %arg10[%c0_50, %c0_51] : memref<64x32xf32, #tpu.memory_space<vmem>>, vector<64x32xf32>
    %cst_52 = arith.constant dense<0.000000e+00> : vector<8x32xf32>
    %134 = tpu.matmul %132, %133, %cst_52 {dimension_numbers = #tpu.dot_dimension_numbers<[1], [0], [0], [1], [0, 0, 1, 1], [], []>} : vector<8x64xf32>, vector<64x32xf32>, vector<8x32xf32> -> vector<8x32xf32>
    %c0_53 = arith.constant 0 : index
    %c0_54 = arith.constant 0 : index
    %135 = vector.load %arg11[%c0_53, %c0_54] : memref<1x32xf32, #tpu.memory_space<vmem>>, vector<1x32xf32>
    %136 = vector.broadcast %135 : vector<1x32xf32> to vector<8x32xf32>
    %137 = arith.addf %134, %136 : vector<8x32xf32>
    %138 = arith.addf %101, %137 : vector<8x32xf32>
    %139 = vector.shape_cast %138 : vector<8x32xf32> to vector<1x8x32xf32>
    %c0_55 = arith.constant 0 : index
    %c0_56 = arith.constant 0 : index
    %c0_57 = arith.constant 0 : index
    %140 = vector.load %arg12[%c0_55, %c0_56, %c0_57] : memref<1x8x32xf32, #tpu.memory_space<vmem>>, vector<1x8x32xf32>
    tpu.vector_store %arg12[%c0_55, %c0_56, %c0_57], %139 {strides = array<i32>} : memref<1x8x32xf32, #tpu.memory_space<vmem>>, vector<1x8x32xf32>,
    return
  }
  func.func @transform_0(%arg0: i32) -> (i32, i32, i32) {
    %c0_i32 = arith.constant 0 : i32
    %c0_i32_0 = arith.constant 0 : i32
    %c0_i32_1 = arith.constant 0 : i32
    return %arg0, %c0_i32, %c0_i32_0 : i32, i32, i32
  }
  func.func @transform_1(%arg0: i32) -> (i32, i32, i32) {
    %c0_i32 = arith.constant 0 : i32
    %c0_i32_0 = arith.constant 0 : i32
    %c0_i32_1 = arith.constant 0 : i32
    return %arg0, %c0_i32, %c0_i32_0 : i32, i32, i32
  }
  func.func @transform_2(%arg0: i32) -> (i32, i32) {
    %c0_i32 = arith.constant 0 : i32
    %c0_i32_0 = arith.constant 0 : i32
    %c0_i32_1 = arith.constant 0 : i32
    return %c0_i32, %c0_i32_0 : i32, i32
  }
  func.func @transform_3(%arg0: i32) -> (i32, i32) {
    %c0_i32 = arith.constant 0 : i32
    %c0_i32_0 = arith.constant 0 : i32
    %c0_i32_1 = arith.constant 0 : i32
    return %c0_i32, %c0_i32_0 : i32, i32
  }
  func.func @transform_4(%arg0: i32) -> (i32, i32) {
    %c0_i32 = arith.constant 0 : i32
    %c0_i32_0 = arith.constant 0 : i32
    %c0_i32_1 = arith.constant 0 : i32
    return %c0_i32, %c0_i32_0 : i32, i32
  }
  func.func @transform_5(%arg0: i32) -> (i32, i32) {
    %c0_i32 = arith.constant 0 : i32
    %c0_i32_0 = arith.constant 0 : i32
    %c0_i32_1 = arith.constant 0 : i32
    return %c0_i32, %c0_i32_0 : i32, i32
  }
  func.func @transform_6(%arg0: i32) -> (i32, i32) {
    %c0_i32 = arith.constant 0 : i32
    %c0_i32_0 = arith.constant 0 : i32
    %c0_i32_1 = arith.constant 0 : i32
    return %c0_i32, %c0_i32_0 : i32, i32
  }
  func.func @transform_7(%arg0: i32) -> (i32, i32) {
    %c0_i32 = arith.constant 0 : i32
    %c0_i32_0 = arith.constant 0 : i32
    %c0_i32_1 = arith.constant 0 : i32
    return %c0_i32, %c0_i32_0 : i32, i32
  }
  func.func @transform_8(%arg0: i32) -> (i32, i32) {
    %c0_i32 = arith.constant 0 : i32
    %c0_i32_0 = arith.constant 0 : i32
    %c0_i32_1 = arith.constant 0 : i32
    return %c0_i32, %c0_i32_0 : i32, i32
  }
  func.func @transform_9(%arg0: i32) -> (i32, i32) {
    %c0_i32 = arith.constant 0 : i32
    %c0_i32_0 = arith.constant 0 : i32
    %c0_i32_1 = arith.constant 0 : i32
    return %c0_i32, %c0_i32_0 : i32, i32
  }
  func.func @transform_10(%arg0: i32) -> (i32, i32) {
    %c0_i32 = arith.constant 0 : i32
    %c0_i32_0 = arith.constant 0 : i32
    %c0_i32_1 = arith.constant 0 : i32
    return %c0_i32, %c0_i32_0 : i32, i32
  }
  func.func @transform_11(%arg0: i32) -> (i32, i32, i32) {
    %c0_i32 = arith.constant 0 : i32
    %c0_i32_0 = arith.constant 0 : i32
    %c0_i32_1 = arith.constant 0 : i32
    return %arg0, %c0_i32, %c0_i32_0 : i32, i32, i32
  }
  func.func @transform_12(%arg0: i32) -> (i32, i32, i32, i32) {
    %c0_i32 = arith.constant 0 : i32
    %c0_i32_0 = arith.constant 0 : i32
    %c0_i32_1 = arith.constant 0 : i32
    %c0_i32_2 = arith.constant 0 : i32
    return %arg0, %c0_i32, %c0_i32_0, %c0_i32_1 : i32, i32, i32, i32
  }
}

</mosaic_0001>

<bundles_post_ra>
// kernel: tpu_custom_call.1
= control target key start
LH: loop header
LB: loop body
LE: loop exit
PB: predicated region body
PF: predicated region fallthrough
CT: control target
= control target key end

     0   :  { %s2738_s0 = inlined_call_operand.hbm [shape: f32[2,8,32], index: 0, kind: input, shape index: {}]   ;;  %s2739_s1 = inlined_call_operand.hbm [shape: s32[2,8,8], index: 1, kind: input, shape index: {}]   ;;  %s2740_s2 = inlined_call_operand.hbm [shape: f32[4,32], index: 2, kind: input, shape index: {}]   ;;  %s2741_s3 = inlined_call_operand.vmem [shape: f32[32,96], index: 3, kind: input, shape index: {}]   ;;  %s2742_s4 = inlined_call_operand.vmem [shape: f32[1,96], index: 4, kind: input, shape index: {}]   ;;  %s2743_s5 = inlined_call_operand.vmem [shape: f32[32,32], index: 5, kind: input, shape index: {}]   ;;  %s2744_s6 = inlined_call_operand.vmem [shape: f32[1,32], index: 6, kind: input, shape index: {}]   ;;  %s2745_s7 = inlined_call_operand.vmem [shape: f32[32,64], index: 7, kind: input, shape index: {}]   ;;  %s2746_s8 = inlined_call_operand.vmem [shape: f32[1,64], index: 8, kind: input, shape index: {}]   ;;  %s2747_s9 = inlined_call_operand.vmem [shape: f32[64,32], index: 9, kind: input, shape index: {}]   ;;  %s2748_s10 = inlined_call_operand.vmem [shape: f32[1,32], index: 10, kind: input, shape index: {}]   ;;  %s2749_s11 = inlined_call_operand.hbm [shape: f32[2,8,32], index: 11, kind: output, shape index: {0}]   ;;  %s2750_s12 = inlined_call_operand.hbm [shape: f32[2,4,8,8], index: 12, kind: output, shape index: {1}]  }
   0x1   :  { %2762 = sst [smem:[#allocation21_spill]] %s2740_s2 }
   0x2   :  { %2763 = sst [smem:[#allocation22_spill]] %s2748_s10 }
   0x3   :  { %2764 = sst [smem:[#allocation23_spill]] %s2749_s11 }
   0x4   :  { %2765 = sst [smem:[#allocation24_spill]] %s2750_s12 }
   0x5   :  { %18 = vsyncpa [#allocation3], 0 }
   0x6   :  { %20 = vsyncpa [#allocation3 + $0x1], 0 }
   0x7   :  { %21 = vsyncpa [#allocation6], 0 }
   0x8   :  { %23 = vsyncpa [#allocation6 + $0x1], 0 }
   0x9   :  { %24 = vsyncpa [#allocation4], 0 }
   0xa   :  { %26 = vsyncpa [#allocation4 + $0x1], 0 }
   0xb   :  { %27 = vsyncpa [#allocation10], 0 }
   0xc   :  { %29 = vsyncpa [#allocation10 + $0x1], 0  ;;  %s2300_s21 = smov 0   ;;  %s2302_s22 = smov 0  }
   0xd   :  { %s2304_s23 = smov 0   ;;  %s2306_s24 = smov 0  }
   0xe LB: > { %2766 = sst [smem:[#allocation16_spill]] %s2199_s21  ;;  %s2321_s25 = sadd.s32 4294967295, %s2211_s24   ;;  %s2211_s24 = sphi %s2306_s24, %s2792_s24   ;;  %s2207_s23 = sphi %s2304_s23, %s2794_s23   ;;  %s2203_s22 = sphi %s2302_s22, %s2796_s22   ;;  %s2199_s21 = sphi %s2300_s21, %s2795_s21  }
   0xf   : > { %2767 = sst [smem:[#allocation17_spill]] %s2207_s23  ;;  %s1745_s26 = sadd.s32 4294967294, %s2211_s24  }
  0x10   : > { %p55_p0 = scmp.ne.s32.totalorder %s2203_s22, %s2199_s21  ;;  %p2751_p1 = scmp.eq.s32.totalorder %s2321_s25, 0 }
  0x11   : > { %p300_p3 = scmp.eq.s32.totalorder %s1745_s26, 1  ;;  %p1746_p5 = scmp.ge.s32.totalorder %s2211_s24, 1 }
  0x12   : > { %p2330_p4 = por %p2751_p1, %p55_p0  ;;  %p333_p7 = scmp.lt.s32.totalorder %s2211_s24, 3 }
  0x13   : > { %p2335_p6 = por %p300_p3, %p55_p0  ;;  %s2213_s30 = smov [#allocation7]  }
  0x14   : > { %s2768_s27 = scalar_select %p2330_p4, 1, 0 }
  0x15   : > { %s2769_s28 = scalar_select %p2335_p6, 1, 0 }
  0x16   : > { %p2340_p8 = pnand %p1746_p5, %p333_p7  ;;  %s346_s13 = sshll.u32 %s2213_s30, 4  ;;  %s347_s13 = int_to_ptr.vmem [resolvable:$true] %s346_s13 }
  0x17   : > { %2770 = sst [smem:[#allocation18_spill]] %s2769_s28  ;;  %s2348_s14 = sadd.s32 1, %s2211_s24  }
  0x18   : > { %s2771_s29 = scalar_select %p2340_p8, 1, 0 }
  0x19   : > { %p1935_p10 = pneg %p2340_p8  ;;  %2772 = sst [smem:[#allocation19_spill]] %s2348_s14 }
  0x1a   : > { %s39_s16 = ssub.s32 %s2211_s24, %s2348_s14  ;;  %s42_s18 = sadd.s32 1, %s2207_s23 }
  0x1b   : > { %p2352_p11 = pnand %p1935_p10, %p2751_p1  ;;  %p2358_p12 = scmp.eq.s32.totalorder %s39_s16, 0 }
  0x1c   : > { %p49_p13 = scmp.ne.s32.totalorder %s2207_s23, %s2203_s22  ;;  %s2038_s19 = scalar_lea.vmem %s347_s13, 64 }
  0x1d   : > { %p2029_p0 = pneg %p2352_p11  ;;  %p2039_p3 = scmp.ne.s32.totalorder %s347_s13, %s2038_s19 }
  0x1e   : > { %p2046_p9 = scmp.lt.s32.totalorder %s347_s13, %s347_s13  ;;  %p2047_p2 = scmp.lt.s32.totalorder %s2038_s19, %s2038_s19 }
  0x1f   : > { %p2041_p5 = pnand %p2039_p3, %p2029_p0 }
  0x20   : > { %p2048_p10 = por %p2047_p2, %p2046_p9 }
  0x21   : > { %p2042_p7 = pneg %p2041_p5 }
  0x23   : > { %p2049_p1 = pnand %p2048_p10, %p2042_p7 }
  0x25   : > { %2052 = shalt.err (!%p2049_p1)
}
  0x26   : > { %s2775_s2 = sld [smem:[#allocation21_spill]]  ;;  %p50_p1 = scmp.eq.s32.totalorder %s2211_s24, 0 }
  0x27   : > { %s2375_s30 = scalar_select %p2358_p12, %s2207_s23, %s42_s18  }
  0x28   : > { %p2777_p2 = scmp.eq.s32.totalorder %s2321_s25, 1  ;;  %p1954_p0 = scmp.lt.s32.totalorder %s2211_s24, 2 }
  0x29   : > { %2776 = sst [smem:[#allocation20_spill]] %s2375_s30  ;;  %s381_s16 = sand.u32 1, %s2207_s23  }
  0x2a   : > { %p2383_p9 = por %p2777_p2, %p49_p13  ;;  %p51_p3 = por %p50_p1, %p49_p13 }
  0x2b   : > { %s2392_s19 = sshll.u32 %s381_s16, 3  ;;  %s1750_s20 = sshll.u32 %s2211_s24, 7 }
  0x2c   : > { %1938 = dma.hbm_to_vmem [thread:$0]  (!%p2352_p11), %s2775_s2, 64, %s347_s13, [#allocation6]  }
  0x2d   : > { %s2778_s15 = scalar_select %p2383_p9, 1, 0 }
  0x2e   : > { %s2398_s17 = scalar_lea.hbm %s2738_s0, %s1750_s20  ;;  %s385_s18 = scalar_lea.vmem [#allocation2], %s2392_s19 }
  0x2f   : > { %s392_s2 = sshll.u32 %s385_s18, 4  ;;  %p2401_p11 = pnand %p1954_p0, %p51_p3  ;;  %s393_s2 = int_to_ptr.vmem [resolvable:$true] %s392_s2 }
  0x30   : > { %s2408_s28 = scalar_lea.hbm %s2739_s1, %s1750_s20  ;;  %s382_s26 = scalar_lea.sflag [#allocation3], %s381_s16 }
  0x31   : > { %s2053_s13 = scalar_lea.hbm %s2398_s17, 128  ;;  %p2055_p13 = pneg %p2401_p11 }
  0x32   : > { %p2054_p12 = scmp.ne.s32.totalorder %s2398_s17, %s2053_s13  ;;  %s2058_s11 = scalar_lea.hbm %s2738_s0, 256 }
  0x33   : > { %p2059_p10 = scmp.lt.s32.totalorder %s2398_s17, %s2738_s0  ;;  %p2060_p1 = scmp.lt.s32.totalorder %s2058_s11, %s2053_s13 }
  0x34   : > { %p2056_p5 = pnand %p2055_p13, %p2054_p12 }
  0x35   : > { %p2061_p2 = por %p2060_p1, %p2059_p10 }
  0x36   : > { %p2057_p7 = pneg %p2056_p5 }
  0x38   : > { %p2062_p0 = pnand %p2061_p2, %p2057_p7 }
  0x3a   : > { %2065 = shalt.err (!%p2062_p0)
}
  0x3b   : > { %s2066_s23 = scalar_lea.vmem %s393_s2, 128  ;;  %s2214_s14 = smov [#allocation2]  }
  0x3c   : > { %p2067_p3 = scmp.ne.s32.totalorder %s393_s2, %s2066_s23  ;;  %s2071_s16 = sshll.u32 %s2214_s14, 4  ;;  %s2072_s16 = int_to_ptr.vmem [resolvable:$false] %s2071_s16 }
  0x3d   : > { %s2073_s21 = scalar_lea.vmem %s2072_s16, 256  ;;  %p2074_p5 = scmp.lt.s32.totalorder %s393_s2, %s2072_s16 }
  0x3e   : > { %p2069_p6 = pnand %p2067_p3, %p2055_p13  ;;  %p2075_p9 = scmp.lt.s32.totalorder %s2073_s21, %s2066_s23 }
  0x40   : > { %p2070_p12 = pneg %p2069_p6  ;;  %p2076_p4 = por %p2075_p9, %p2074_p5 }
  0x42   : > { %p2077_p8 = pnand %p2076_p4, %p2070_p12 }
  0x44   : > { %2080 = shalt.err (!%p2077_p8)
}
  0x45   : > { %1942 = dma.hbm_to_vmem [thread:$0]  (!%p2401_p11), %s2398_s17, 128, %s393_s2, %s382_s26  }
  0x46   : > { %s399_s10 = sand.u32 1, %s2211_s24   ;;  %s403_s11 = scalar_lea.vmem [#allocation5], %s2392_s19 }
  0x47   : > { %s410_s12 = sshll.u32 %s403_s11, 4  ;;  %s400_s20 = scalar_lea.sflag [#allocation6], %s399_s10  ;;  %s411_s12 = int_to_ptr.vmem [resolvable:$true] %s410_s12 }
  0x48   : > { %s2081_s13 = scalar_lea.hbm %s2408_s28, 128  ;;  %s2086_s14 = scalar_lea.hbm %s2739_s1, 256 }
  0x49   : > { %p2082_p6 = scmp.ne.s32.totalorder %s2408_s28, %s2081_s13  ;;  %p2087_p9 = scmp.lt.s32.totalorder %s2408_s28, %s2739_s1 }
  0x4a   : > { %p2088_p7 = scmp.lt.s32.totalorder %s2086_s14, %s2081_s13 }
  0x4b   : > { %p2084_p4 = pnand %p2082_p6, %p2055_p13 }
  0x4c   : > { %p2089_p10 = por %p2088_p7, %p2087_p9 }
  0x4d   : > { %p2085_p8 = pneg %p2084_p4 }
  0x4f   : > { %p2090_p1 = pnand %p2089_p10, %p2085_p8 }
  0x51   : > { %2093 = shalt.err (!%p2090_p1)
}
  0x52   : > { %s2094_s2 = scalar_lea.vmem %s411_s12, 128  ;;  %s2215_s19 = smov [#allocation5]  }
  0x53   : > { %p2095_p2 = scmp.ne.s32.totalorder %s411_s12, %s2094_s2  ;;  %s2099_s17 = sshll.u32 %s2215_s19, 4  ;;  %s2100_s17 = int_to_ptr.vmem [resolvable:$false] %s2099_s17 }
  0x54   : > { %s2101_s26 = scalar_lea.vmem %s2100_s17, 256  ;;  %p2102_p12 = scmp.lt.s32.totalorder %s411_s12, %s2100_s17 }
  0x55   : > { %p2097_p0 = pnand %p2095_p2, %p2055_p13  ;;  %p2103_p5 = scmp.lt.s32.totalorder %s2101_s26, %s2094_s2 }
  0x57   : > { %p2098_p3 = pneg %p2097_p0  ;;  %p2104_p6 = por %p2103_p5, %p2102_p12 }
  0x59   : > { %p2105_p4 = pnand %p2104_p6, %p2098_p3 }
  0x5b   : > { %2108 = shalt.err (!%p2105_p4)
}
  0x5c   : > { %1945 = dma.hbm_to_vmem [thread:$0]  (!%p2401_p11), %s2408_s28, 128, %s411_s12, %s400_s20  }
  0x5d   : > { %p2780_p8 = scmp.ne.s32.totalorder %s2771_s29, 0 }
  0x5e   : > { %s2453_s10 = sand.u32 (!%p2780_p8), 1, %s2203_s22   ;;  %p2781_p13 = scmp.ne.s32.totalorder (!%p2780_p8), %s2768_s27, 0 }
  0x5f   : > { %419 = sbr.rel (%p2780_p8) target bundleno = 2473 (0x9a9), region = 64  ;;  %s2456_s11 = sshll.u32 (!%p2780_p8), %s2453_s10, 3 }
  0x60   : > { %s422_s13 = scalar_lea.sflag (!%p2780_p8), [#allocation3], %s2453_s10  ;;  %s425_s18 = scalar_lea.vmem (!%p2780_p8), [#allocation2], %s2456_s11 }
  0x64   : > { %2178 = dma.done.wait (%p2781_p13), %s422_s13, 128  }
  0x65   : > { %2180 = vsyncadd (%p2781_p13), %s422_s13, 4294967168  ;;  %s430_s28 = sand.u32 1, %s2321_s25   ;;  %s434_s30 = scalar_lea.vmem [#allocation5], %s2456_s11 }
  0x66   : > { %s431_s29 = scalar_lea.sflag [#allocation6], %s430_s28 }
  0x67   : > { %2182 = dma.done.wait (%p2781_p13), %s431_s29, 128  }
  0x68   : > { %2184 = vsyncadd (%p2781_p13), %s431_s29, 4294967168  ;;  %p2782_p11 = scmp.eq.s32.totalorder %s2321_s25, 0 }
  0x6a   : > { %2186 = dma.done.wait (%p2782_p11), [#allocation6], 64   ;;  %p2783_p9 = pmov %p2782_p11 }
  0x6b   : > { %vm494_vm0 = vcmask 261120   ;;  %v2474_v0 = vld [vmem:[%s425_s18] sm:$0xff]  ;;  %v522_v7 = vld [vmem:[%s2741_s3 + $0x18] sm:$0xff]  ;;  %v2216_v8 = vmov 0.0   ;;  %v521_v9 = vld [vmem:[%s2741_s3 + $0x10] sm:$0xff]  ;;  %vm2217_vm1 = vmmov 0  }
  0x6c   : > { %2188 = vsyncadd (%p2783_p9), [#allocation6], 4294967232  ;;  %v495_v1 = vsel %vm494_vm0, %v2474_v0, 0.0  ;;  %1831 = vmatprep.subr.mxu1 %v2216_v8  ;;  %1839 = vmatprep.mubr.msk.f32.mxu1 %vm2217_vm1, %v2216_v8  ;;  %v520_v10 = vld [vmem:[%s2741_s3 + $0x8] sm:$0xff]  ;;  %v519_v11 = vld [vmem:[%s2741_s3] sm:$0xff]  ;;  %s2218_s26 = smov 120  }
  0x6d   : > { %496 = vadd.xlane.f32.xlu0 %v495_v1  ;;  %1832 = vmatpush3.msra.mxu1 %v522_v7  ;;  %v1759_v16 = vld [vmem:[#allocation7] ss:$0 sm:$0xff]  ;;  %v1760_v18 = vld [vmem:[#allocation7 + $0x1] ss:$0 sm:$0xff]  ;;  %s2219_s13 = smov 96   ;;  %s2220_s18 = smov 88  }
  0x6e   : > { %1852 = vmatprep.subr.mxu0 %v2216_v8  ;;  %1833 = vmatprep.subr.mxu1 %v2216_v8  ;;  %v1761_v21 = vld [vmem:[%s2742_s4] ss:$0 sm:$0xff]  ;;  %s2221_s28 = smov 80   ;;  %s2222_s29 = smov 72   ;;  %vm606_vm2 = vcmask 64512   ;;  %v490_v32 = vld [vmem:[%s434_s30] sm:$0xff] }
  0x6f   : > { %1854 = vmatprep.mubr.msk.f32.mxu0 %vm2217_vm1, %v2216_v8  ;;  %1834 = vmatpush3.msra.mxu1 %v521_v9  ;;  %s2223_s27 = smov 112   ;;  %s2224_s12 = smov 104   ;;  %vm491_vm3 = vcmp.eq.s32.totalorder %v490_v32, 0  ;;  %vm1286_vm4 = vcmask 130048   ;;  %vm1288_vm5 = vcmask 195584   ;;  %vm1500_vm6 = vcmask 523264  }
  0x70   : > { %1835 = vmatprep.subr.mxu1 %v2216_v8  ;;  %s2225_s30 = smov 64   ;;  %s2226_s20 = smov 48  }
  0x71   : > { %1836 = vmatpush3.msra.mxu1 %v520_v10  ;;  %s2227_s23 = smov 40   ;;  %s2228_s14 = smov 56  }
  0x72   : > { %1837 = vmatprep.subr.mxu1 %v2216_v8  ;;  %s1758_s16 = sshll.u32 %s2453_s10, 5  ;;  %s2784_s2 = sld [smem:[#allocation24_spill]] }
  0x73   : > { %1838 = vmatpush3.msra.mxu1 %v519_v11  ;;  %s2558_s21 = scalar_lea.vmem [#allocation9], %s1758_s16  ;;  %s1582_s17 = scalar_lea.sflag [#allocation10], %s2453_s10 }
  0x74   : > { %1842 = vmatprep.subr.mxu1 %v2216_v8  ;;  %p2785_p10 = scmp.ne.s32.totalorder %s2778_s15, 0 }
  0xf6   : > { %v497_v2 = vpop.xlane.xlu0 %496 }
  0xf7   : > { %v499_v3 = vmul.f32 0.03125, %v497_v2 }
  0xf9   : > { %v500_v4 = vsub.f32 %v2474_v0, %v499_v3 }
  0xfb   : > { %v501_v5 = vmul.f32 %v500_v4, %v500_v4 }
  0xfd   : > { %v502_v6 = vsel %vm494_vm0, %v501_v5, 0.0 }
  0xfe   : > { %503 = vadd.xlane.f32.xlu0 %v502_v6 }
 0x187   : > { %v504_v12 = vpop.xlane.xlu0 %503 }
 0x188   : > { %v505_v13 = vmul.f32 0.03125, %v504_v12 }
 0x18a   : > { %v506_v14 = vadd.f32 1e-12, %v505_v13 }
 0x18c   : > { %2007 = vrsqrt.f32 %v506_v14 }
 0x199   : > { %v2008_v15 = vpop.eup %2007 }
 0x19a   : > { %v508_v17 = vmul.f32 %v2008_v15, %v500_v4 }
 0x19c   : > { %v513_v19 = vmul.f32 %v1759_v16, %v508_v17 }
 0x19e   : > { %v518_v20 = vadd.f32 %v1760_v18, %v513_v19 }
 0x1a0   : > { %1840 = vmatmul.mubr.msk.f32.vlgmr.msra.gmra.mxu1 %vm494_vm0, %v518_v20 }
 0x1a1   : > { %1844 = vmatprep.mubr.msk.f32.mxu1 %vm2217_vm1, %v2216_v8 }
 0x260   : > { %v599_v22 = vpop.f32.mrf.mxu1 }
 0x261   : > { %v2508_v23 = vadd.f32 %v1761_v21, %v599_v22 }
 0x262   : > { %v1841_v24 = vpop.f32.mrf.mxu1 }
 0x263   : > { %681 = vrot.lane.b32.xlu0 %v2508_v23, %s2218_s26  ;;  %604 = vrot.lane.b32.xlu1 %v2508_v23, %s2219_s13  ;;  %s2232_s13 = smov [#allocation9]  }
 0x267   : > { %683 = vrot.lane.b32.xlu1 %v2508_v23, %s2220_s18  ;;  %s2113_s18 = sshll.u32 %s2232_s13, 4  ;;  %s2114_s18 = int_to_ptr.vmem [resolvable:$false] %s2113_s18 }
 0x26b   : > { %761 = vrot.lane.b32.xlu1 %v2508_v23, %s2221_s28 }
 0x26f   : > { %839 = vrot.lane.b32.xlu1 %v2508_v23, %s2222_s29 }
 0x273   : > { %759 = vrot.lane.b32.xlu1 %v2508_v23, %s2223_s27  ;;  %s2229_s27 = smov 8  }
 0x277   : > { %837 = vrot.lane.b32.xlu1 %v2508_v23, %s2224_s12  ;;  %s2230_s12 = smov 16  }
 0x2d5   : > { %v605_v25 = vpop.permute.xlu1 %604  ;;  %v682_v27 = vpop.permute.xlu0 %681 }
 0x2d6   : > { %1843 = vmatpush3.xpose.msk.msra.mxu1 %vm606_vm2, %v605_v25  ;;  %v1292_v25 = vld [vmem:[%s2743_s5 + $0x10] sm:$0xff] }
 0x2d7   : > { %1847 = vmatprep.subr.mxu1 %v2216_v8 }
 0x2d9   : > { %1845 = vmatmul.mubr.msk.f32.vlgmr.msra.gmra.mxu1 %vm606_vm2, %v2508_v23  ;;  %v684_v26 = vpop.permute.xlu1 %683 }
 0x2da   : > { %1848 = vmatpush3.xpose.msk.msra.mxu1 %vm606_vm2, %v684_v26  ;;  %1849 = vmatprep.mubr.msk.f32.mxu1 %vm2217_vm1, %v2216_v8  ;;  %v1291_v26 = vld [vmem:[%s2743_s5 + $0x8] sm:$0xff] }
 0x2db   : > { %1857 = vmatprep.subr.mxu1 %v2216_v8 }
 0x2dd   : > { %1850 = vmatmul.mubr.msk.f32.vlgmr.msra.gmra.mxu1 %vm606_vm2, %v682_v27  ;;  %v762_v28 = vpop.permute.xlu1 %761 }
 0x2de   : > { %1853 = vmatpush3.xpose.msk.msra.mxu0 %vm606_vm2, %v762_v28  ;;  %1859 = vmatprep.mubr.msk.f32.mxu1 %vm2217_vm1, %v2216_v8  ;;  %v1290_v28 = vld [vmem:[%s2743_s5] sm:$0xff] }
 0x2df   : > { %1862 = vmatprep.subr.mxu0 %v2216_v8 }
 0x2e1   : > { %v840_v29 = vpop.permute.xlu1 %839 }
 0x2e2   : > { %1858 = vmatpush3.xpose.msk.msra.mxu1 %vm606_vm2, %v840_v29 }
 0x2e3   : > { %1867 = vmatprep.subr.mxu1 %v2216_v8 }
 0x2e5   : > { %v760_v30 = vpop.permute.xlu1 %759 }
 0x2e6   : > { %1855 = vmatmul.mubr.msk.f32.vlgmr.msra.gmra.mxu0 %vm606_vm2, %v760_v30 }
 0x2e7   : > { %1864 = vmatprep.mubr.msk.f32.mxu0 %vm2217_vm1, %v2216_v8 }
 0x2e9   : > { %v838_v31 = vpop.permute.xlu1 %837 }
 0x2ea   : > { %1860 = vmatmul.mubr.msk.f32.vlgmr.msra.gmra.mxu1 %vm606_vm2, %v838_v31 }
 0x2eb   : > { %1869 = vmatprep.mubr.msk.f32.mxu1 %vm2217_vm1, %v2216_v8 }
 0x399   : > { %v677_v33 = vpop.f32.mrf.mxu1 }
 0x39a   : > { %v917_v34 = vsel %vm491_vm3, -1024.0, %v677_v33 }
 0x39b   : > { %v1846_v35 = vpop.f32.mrf.mxu1  ;;  %v921_v36 = vsel %vm606_vm2, %v917_v34, -inf }
 0x39c   : > { %922 = vmax.xlane.f32.xlu1 %v921_v36 }
 0x39d   : > { %v755_v37 = vpop.f32.mrf.mxu1 }
 0x39e   : > { %v918_v38 = vsel %vm491_vm3, -1024.0, %v755_v37 }
 0x39f   : > { %v1851_v39 = vpop.f32.mrf.mxu1  ;;  %v924_v40 = vsel %vm606_vm2, %v918_v38, -inf }
 0x3a0   : > { %925 = vmax.xlane.f32.xlu0 %v924_v40 }
 0x3a6   : > { %v833_v41 = vpop.f32.mrf.mxu0 }
 0x3a7   : > { %v919_v42 = vsel %vm491_vm3, -1024.0, %v833_v41  ;;  %v1775_v41 = vld [vmem:[%s2744_s6] ss:$0 sm:$0xff] }
 0x3a8   : > { %v1856_v43 = vpop.f32.mrf.mxu0  ;;  %v927_v44 = vsel %vm606_vm2, %v919_v42, -inf }
 0x3a9   : > { %928 = vmax.xlane.f32.xlu1 %v927_v44 }
 0x3aa   : > { %v911_v45 = vpop.f32.mrf.mxu1 }
 0x3ab   : > { %v920_v46 = vsel %vm491_vm3, -1024.0, %v911_v45 }
 0x3ac   : > { %v1861_v47 = vpop.f32.mrf.mxu1  ;;  %v930_v48 = vsel %vm606_vm2, %v920_v46, -inf }
 0x3ad   : > { %931 = vmax.xlane.f32.xlu0 %v930_v48 }
 0x3ba   : > { %969 = vrot.lane.b32.xlu1 %v2508_v23, %s2225_s30  ;;  %s2231_s30 = smov 24  }
 0x425   : > { %v923_v49 = vpop.xlane.xlu1 %922 }
 0x426   : > { %v933_v50 = vsub.f32 %v917_v34, %v923_v49 }
 0x428   : > { %v937_v51 = vmul.f32 1.442695, %v933_v50 }
 0x429   : > { %v926_v52 = vpop.xlane.xlu0 %925 }
 0x42a   : > { %2009 = vpow2.f32 %v937_v51  ;;  %v934_v53 = vsub.f32 %v918_v38, %v926_v52  ;;  %v1403_v52 = vld [vmem:[%s2745_s7 + $0x18] sm:$0xff] }
 0x42c   : > { %v939_v54 = vmul.f32 1.442695, %v934_v53  ;;  %v1401_v53 = vld [vmem:[%s2745_s7 + $0x8] sm:$0xff] }
 0x42e   : > { %2011 = vpow2.f32 %v939_v54  ;;  %v1400_v54 = vld [vmem:[%s2745_s7] sm:$0xff] }
 0x432   : > { %v929_v55 = vpop.xlane.xlu1 %928 }
 0x433   : > { %v935_v56 = vsub.f32 %v919_v42, %v929_v55  ;;  %v1492_v55 = vld [vmem:[%s2747_s9 + $0x38] sm:$0xff] }
 0x435   : > { %v941_v57 = vmul.f32 1.442695, %v935_v56  ;;  %v1491_v56 = vld [vmem:[%s2747_s9 + $0x30] sm:$0xff] }
 0x436   : > { %v970_v58 = vpop.permute.xlu1 %969  ;;  %v932_v59 = vpop.xlane.xlu0 %931 }
 0x437   : > { %v2010_v60 = vpop.eup %2009  ;;  %2013 = vpow2.f32 %v941_v57  ;;  %v936_v61 = vsub.f32 %v920_v46, %v932_v59  ;;  %1863 = vmatpush3.msra.mxu0 %v970_v58  ;;  %v1490_v57 = vld [vmem:[%s2747_s9 + $0x28] sm:$0xff]  ;;  %v1489_v58 = vld [vmem:[%s2747_s9 + $0x20] sm:$0xff]  ;;  %v1488_v59 = vld [vmem:[%s2747_s9 + $0x18] sm:$0xff] }
 0x438   : > { %v945_v62 = vsel %vm606_vm2, %v2010_v60, 0.0  ;;  %1872 = vmatprep.subr.mxu0 %v2216_v8 }
 0x439   : > { %v943_v63 = vmul.f32 1.442695, %v936_v61  ;;  %946 = vadd.xlane.f32.xlu1 %v945_v62 }
 0x43b   : > { %v2012_v1 = vpop.eup %2011  ;;  %2015 = vpow2.f32 %v943_v63 }
 0x43c   : > { %v948_v2 = vsel %vm606_vm2, %v2012_v1, 0.0 }
 0x43d   : > { %949 = vadd.xlane.f32.xlu0 %v948_v2 }
 0x444   : > { %v2014_v3 = vpop.eup %2013 }
 0x445   : > { %v951_v4 = vsel %vm606_vm2, %v2014_v3, 0.0 }
 0x446   : > { %952 = vadd.xlane.f32.xlu1 %v951_v4 }
 0x448   : > { %v2016_v5 = vpop.eup %2015 }
 0x449   : > { %v954_v6 = vsel %vm606_vm2, %v2016_v5, 0.0 }
 0x44a   : > { %955 = vadd.xlane.f32.xlu0 %v954_v6  ;;  %v1487_v6 = vld [vmem:[%s2747_s9 + $0x10] sm:$0xff] }
 0x457   : > { %1121 = vrot.lane.b32.xlu1 %v2508_v23, %s2226_s20  ;;  %s1790_s20 = sshll.u32 %s2321_s25, 9 }
 0x458   : > { %s2669_s19 = scalar_lea.hbm %s2784_s2, %s1790_s20 }
 0x45b   : > { %1197 = vrot.lane.b32.xlu1 %v2508_v23, %s2227_s23  ;;  %s1608_s23 = sshll.u32 %s2558_s21, 4  ;;  %s2671_s23 = int_to_ptr.vmem [resolvable:$true] %s1608_s23 }
 0x45c   : > { %s2109_s26 = scalar_lea.vmem %s2671_s23, 512  ;;  %p2116_p0 = scmp.lt.s32.totalorder %s2671_s23, %s2114_s18 }
 0x45d   : > { %p2110_p7 = scmp.ne.s32.totalorder %s2671_s23, %s2109_s26 }
 0x45f   : > { %p2111_p1 = pnand %p2110_p7, %p2785_p10 }
 0x460   : > { %1045 = vrot.lane.b32.xlu0 %v2508_v23, %s2228_s14  ;;  %v1293_v23 = vld [vmem:[%s2743_s5 + $0x18] sm:$0xff] }
 0x461   : > { %p2112_p2 = pneg %p2111_p1 }
 0x4c2   : > { %v947_v7 = vpop.xlane.xlu1 %946 }
 0x4c3   : > { %2017 = vrcp.f32 %v947_v7  ;;  %v1486_v7 = vld [vmem:[%s2747_s9 + $0x8] sm:$0xff] }
 0x4c6   : > { %v950_v9 = vpop.xlane.xlu0 %949 }
 0x4c7   : > { %2019 = vrcp.f32 %v950_v9  ;;  %v1485_v9 = vld [vmem:[%s2747_s9] sm:$0xff] }
 0x4cf   : > { %v953_v10 = vpop.xlane.xlu1 %952 }
 0x4d0   : > { %v2018_v11 = vpop.eup %2017  ;;  %2021 = vrcp.f32 %v953_v10  ;;  %v1779_v10 = vld [vmem:[%s2746_s8] ss:$0 sm:$0xff] }
 0x4d1   : > { %v958_v12 = vmul.f32 %v2018_v11, %v2010_v60 }
 0x4d3   : > { %965 = vst.msk [vmem:[%s2558_s21] sm:$0xff] %vm606_vm2, %v958_v12  ;;  %1865 = vmatmul.mubr.msk.f32.vlgmr.msra.gmra.mxu0 %vm606_vm2, %v958_v12  ;;  %v1122_v13 = vpop.permute.xlu1 %1121  ;;  %v956_v14 = vpop.xlane.xlu0 %955 }
 0x4d4   : > { %v2020_v15 = vpop.eup %2019  ;;  %2023 = vrcp.f32 %v956_v14  ;;  %1873 = vmatpush3.msra.mxu0 %v1122_v13  ;;  %1874 = vmatprep.mubr.msk.f32.mxu0 %vm2217_vm1, %v2216_v8 }
 0x4d5   : > { %v960_v16 = vmul.f32 %v2020_v15, %v2012_v1  ;;  %1882 = vmatprep.subr.mxu0 %v2216_v8  ;;  %v1777_v1 = vld [vmem:[#allocation7 + $0x2] ss:$0 sm:$0xff] }
 0x4d7   : > { %v1046_v17 = vpop.permute.xlu0 %1045  ;;  %966 = vst.msk [vmem:[%s2558_s21 + $0x8] sm:$0xff] %vm606_vm2, %v960_v16  ;;  %v1198_v18 = vpop.permute.xlu1 %1197 }
 0x4d8   : > { %1868 = vmatpush3.msra.mxu1 %v1046_v17 }
 0x4d9   : > { %1870 = vmatmul.mubr.msk.f32.vlgmr.msra.gmra.mxu1 %vm606_vm2, %v960_v16  ;;  %1877 = vmatprep.subr.mxu1 %v2216_v8 }
 0x4da   : > { %1878 = vmatpush3.msra.mxu1 %v1198_v18  ;;  %1879 = vmatprep.mubr.msk.f32.mxu1 %vm2217_vm1, %v2216_v8 }
 0x4db   : > { %1893 = vmatprep.subr.mxu1 %v2216_v8 }
 0x4dd   : > { %v2022_v19 = vpop.eup %2021 }
 0x4de   : > { %v962_v20 = vmul.f32 %v2022_v19, %v2014_v3  ;;  %v1778_v3 = vld [vmem:[#allocation7 + $0x3] ss:$0 sm:$0xff] }
 0x4e0   : > { %967 = vst.msk [vmem:[%s2558_s21 + $0x10] sm:$0xff] %vm606_vm2, %v962_v20  ;;  %1875 = vmatmul.mubr.msk.f32.vlgmr.msra.gmra.mxu0 %vm606_vm2, %v962_v20 }
 0x4e1   : > { %v2024_v21 = vpop.eup %2023  ;;  %1890 = vmatprep.mubr.msk.f32.mxu0 %vm2217_vm1, %v2216_v8  ;;  %1883 = vmatpush3.msra.mxu0 %v1293_v23 }
 0x4e2   : > { %v964_v22 = vmul.f32 %v2024_v21, %v2016_v5  ;;  %1884 = vmatprep.subr.mxu0 %v2216_v8 }
 0x4e3   : > { %1885 = vmatpush3.msra.mxu0 %v1292_v25 }
 0x4e4   : > { %968 = vst.msk [vmem:[%s2558_s21 + $0x18] sm:$0xff] %vm606_vm2, %v964_v22  ;;  %1880 = vmatmul.mubr.msk.f32.vlgmr.msra.gmra.mxu1 %vm606_vm2, %v964_v22  ;;  %1886 = vmatprep.subr.mxu0 %v2216_v8  ;;  %s2115_s21 = scalar_lea.vmem %s2114_s18, 1024 }
 0x4e5   : > { %1901 = vmatprep.mubr.msk.f32.mxu1 %vm2217_vm1, %v2216_v8  ;;  %1887 = vmatpush3.msra.mxu0 %v1291_v26  ;;  %p2117_p3 = scmp.lt.s32.totalorder %s2115_s21, %s2109_s26 }
 0x4e6   : > { %1888 = vmatprep.subr.mxu0 %v2216_v8  ;;  %1894 = vmatpush3.msra.mxu1 %v1403_v52 }
 0x4e7   : > { %1889 = vmatpush3.msra.mxu0 %v1290_v28  ;;  %1895 = vmatprep.subr.mxu1 %v2216_v8  ;;  %p2118_p12 = por %p2117_p3, %p2116_p0 }
 0x4e8   : > { %1904 = vmatprep.subr.mxu0 %v2216_v8 }
 0x4e9   : > { %p2119_p5 = pnand %p2118_p12, %p2112_p2 }
 0x593   : > { %v1041_v24 = vpop.f32.mrf.mxu0 }
 0x595   : > { %v1866_v27 = vpop.f32.mrf.mxu0 }
 0x599   : > { %v1117_v29 = vpop.f32.mrf.mxu1 }
 0x59a   : > { %1274 = vrot.lane.b32.xlu0 %v1117_v29, %s2229_s27 }
 0x59b   : > { %v1871_v30 = vpop.f32.mrf.mxu1 }
 0x5a0   : > { %v1193_v31 = vpop.f32.mrf.mxu0 }
 0x5a1   : > { %1278 = vrot.lane.b32.xlu1 %v1193_v31, %s2230_s12 }
 0x5a2   : > { %v1876_v32 = vpop.f32.mrf.mxu0 }
 0x5a4   : > { %v1269_v33 = vpop.f32.mrf.mxu1 }
 0x5a5   : > { %1282 = vrot.lane.b32.xlu0 %v1269_v33, %s2231_s30 }
 0x5a6   : > { %v1881_v34 = vpop.f32.mrf.mxu1 }
 0x60c   : > { %v1275_v35 = vpop.permute.xlu0 %1274 }
 0x60d   : > { %v1285_v37 = vsel %vm606_vm2, %v1041_v24, %v1275_v35 }
 0x613   : > { %v1279_v36 = vpop.permute.xlu1 %1278 }
 0x614   : > { %v1287_v38 = vsel %vm1286_vm4, %v1285_v37, %v1279_v36 }
 0x617   : > { %v1283_v39 = vpop.permute.xlu0 %1282 }
 0x618   : > { %v1289_v40 = vsel %vm1288_vm5, %v1287_v38, %v1283_v39 }
 0x619   : > { %1891 = vmatmul.mubr.msk.f32.vlgmr.msra.gmra.mxu0 %vm494_vm0, %v1289_v40 }
 0x61a   : > { %1920 = vmatprep.mubr.msk.f32.mxu0 %vm2217_vm1, %v2216_v8  ;;  %1905 = vmatpush3.msra.mxu0 %v1492_v55 }
 0x61b   : > { %1906 = vmatprep.subr.mxu0 %v2216_v8 }
 0x61c   : > { %1907 = vmatpush3.msra.mxu0 %v1491_v56 }
 0x61d   : > { %1908 = vmatprep.subr.mxu0 %v2216_v8 }
 0x61e   : > { %1909 = vmatpush3.msra.mxu0 %v1490_v57 }
 0x61f   : > { %1910 = vmatprep.subr.mxu0 %v2216_v8 }
 0x620   : > { %1911 = vmatpush3.msra.mxu0 %v1489_v58 }
 0x621   : > { %1912 = vmatprep.subr.mxu0 %v2216_v8 }
 0x622   : > { %1913 = vmatpush3.msra.mxu0 %v1488_v59 }
 0x623   : > { %1914 = vmatprep.subr.mxu0 %v2216_v8 }
 0x624   : > { %1915 = vmatpush3.msra.mxu0 %v1487_v6 }
 0x625   : > { %1916 = vmatprep.subr.mxu0 %v2216_v8 }
 0x626   : > { %1917 = vmatpush3.msra.mxu0 %v1486_v7 }
 0x627   : > { %1918 = vmatprep.subr.mxu0 %v2216_v8 }
 0x628   : > { %1919 = vmatpush3.msra.mxu0 %v1485_v9 }
 0x6d9   : > { %v1370_v42 = vpop.f32.mrf.mxu0 }
 0x6da   : > { %v1371_v43 = vadd.f32 %v1775_v41, %v1370_v42 }
 0x6db   : > { %v1892_v44 = vpop.f32.mrf.mxu0 }
 0x6dc   : > { %v2608_v45 = vadd.f32 %v1371_v43, %v2474_v0  ;;  %v1402_v0 = vld [vmem:[%s2745_s7 + $0x10] sm:$0xff] }
 0x6dd   : > { %1896 = vmatpush3.msra.mxu1 %v1402_v0 }
 0x6de   : > { %v1377_v46 = vsel %vm494_vm0, %v2608_v45, 0.0  ;;  %1897 = vmatprep.subr.mxu1 %v2216_v8 }
 0x6df   : > { %1378 = vadd.xlane.f32.xlu1 %v1377_v46  ;;  %1898 = vmatpush3.msra.mxu1 %v1401_v53 }
 0x6e0   : > { %1899 = vmatprep.subr.mxu1 %v2216_v8 }
 0x6e1   : > { %1900 = vmatpush3.msra.mxu1 %v1400_v54 }
 0x768   : > { %v1379_v47 = vpop.xlane.xlu1 %1378 }
 0x769   : > { %v1380_v48 = vmul.f32 0.03125, %v1379_v47 }
 0x76b   : > { %v1381_v49 = vsub.f32 %v2608_v45, %v1380_v48 }
 0x76d   : > { %v1382_v50 = vmul.f32 %v1381_v49, %v1381_v49 }
 0x76f   : > { %v1383_v51 = vsel %vm494_vm0, %v1382_v50, 0.0 }
 0x770   : > { %1384 = vadd.xlane.f32.xlu0 %v1383_v51 }
 0x7f9   : > { %v1385_v60 = vpop.xlane.xlu0 %1384 }
 0x7fa   : > { %v1386_v61 = vmul.f32 0.03125, %v1385_v60 }
 0x7fc   : > { %v1387_v62 = vadd.f32 1e-12, %v1386_v61 }
 0x7fe   : > { %2025 = vrsqrt.f32 %v1387_v62 }
 0x80b   : > { %v2026_v63 = vpop.eup %2025 }
 0x80c   : > { %v1389_v2 = vmul.f32 %v2026_v63, %v1381_v49 }
 0x80e   : > { %v1394_v4 = vmul.f32 %v1777_v1, %v1389_v2 }
 0x810   : > { %v1399_v5 = vadd.f32 %v1778_v3, %v1394_v4 }
 0x812   : > { %1902 = vmatmul.mubr.msk.f32.vlgmr.msra.gmra.mxu1 %vm494_vm0, %v1399_v5 }
 0x8d2   : > { %v1480_v11 = vpop.f32.mrf.mxu1 }
 0x8d3   : > { %v1481_v12 = vadd.f32 %v1779_v10, %v1480_v11 }
 0x8d4   : > { %v1903_v13 = vpop.f32.mrf.mxu1 }
 0x8d5   : > { %v1484_v14 = vmax.f32 %v1481_v12, 0.0 }
 0x8d7   : > { %1921 = vmatmul.mubr.msk.f32.vlgmr.msra.gmra.mxu0 %vm1500_vm6, %v1484_v14 }
 0x8d8   : > { %2122 = shalt.err (!%p2119_p5)
}
 0x8d9   : > { %s2123_s28 = scalar_lea.hbm %s2669_s19, 512  ;;  %s2127_s30 = scalar_lea.hbm %s2784_s2, 1024 }
 0x8da   : > { %p2124_p6 = scmp.ne.s32.totalorder %s2669_s19, %s2123_s28  ;;  %p2128_p13 = scmp.lt.s32.totalorder %s2669_s19, %s2784_s2 }
 0x8db   : > { %p2129_p11 = scmp.lt.s32.totalorder %s2127_s30, %s2123_s28 }
 0x8dc   : > { %p2125_p4 = pnand %p2124_p6, %p2785_p10 }
 0x8dd   : > { %p2130_p9 = por %p2129_p11, %p2128_p13 }
 0x8de   : > { %p2126_p8 = pneg %p2125_p4 }
 0x8e0   : > { %p2131_p7 = pnand %p2130_p9, %p2126_p8 }
 0x8e2   : > { %2134 = shalt.err (!%p2131_p7)
}
 0x8e3   : > { %s2233_s16 = smov 128   ;;  %s2786_s18 = sld [smem:[#allocation22_spill]] }
 0x8e4   : > { %1932 = dma.vmem_to_hbm [thread:$0]  (%p2785_p10), %s2671_s23, 512, %s2669_s19, %s1582_s17, %s2233_s16, %s2233_s16, %s2229_s27  }
 0x8e5   : > { %s1785_s21 = sshll.u32 %s2321_s25, 7  ;;  %s481_s28 = scalar_lea.vmem [#allocation8], %s2456_s11 }
 0x8e6   : > { %s1595_s29 = sshll.u32 %s481_s28, 4  ;;  %s2787_s20 = sld [smem:[#allocation23_spill]]  ;;  %s1596_s29 = int_to_ptr.vmem [resolvable:$true] %s1595_s29 }
 0x8e7   : > { %s1577_s27 = scalar_lea.sflag [#allocation4], %s2453_s10  ;;  %s2135_s23 = scalar_lea.vmem %s1596_s29, 128 }
 0x8e8   : > { %p2136_p1 = scmp.ne.s32.totalorder %s1596_s29, %s2135_s23  ;;  %s2234_s25 = smov [#allocation8]  }
 0x8e9   : > { %v1781_v8 = vld [vmem:[%s2786_s18] ss:$0 sm:$0xff]  ;;  %s2139_s11 = sshll.u32 %s2234_s25, 4  ;;  %s2140_s11 = int_to_ptr.vmem [resolvable:$false] %s2139_s11 }
 0x8ea   : > { %p2137_p2 = pnand %p2136_p1, %p2785_p10  ;;  %s2141_s19 = scalar_lea.vmem %s2140_s11, 256 }
 0x8eb   : > { %p2142_p3 = scmp.lt.s32.totalorder %s1596_s29, %s2140_s11  ;;  %p2143_p12 = scmp.lt.s32.totalorder %s2141_s19, %s2135_s23 }
 0x8ec   : > { %s1593_s14 = scalar_lea.hbm %s2787_s20, %s1785_s21  ;;  %p2138_p0 = pneg %p2137_p2 }
 0x8ed   : > { %p2144_p5 = por %p2143_p12, %p2142_p3 }
 0x8ef   : > { %p2145_p6 = pnand %p2144_p5, %p2138_p0 }
 0x997   : > { %v1570_v15 = vpop.f32.mrf.mxu0 }
 0x998   : > { %v1571_v16 = vadd.f32 %v1781_v8, %v1570_v15 }
 0x999   : > { %v1922_v17 = vpop.f32.mrf.mxu0 }
 0x99a   : > { %v1574_v18 = vadd.f32 %v1571_v16, %v2608_v45 }
 0x99c   : > { %1575 = vst.msk [vmem:[%s481_s28] sm:$0xff] %vm494_vm0, %v1574_v18 }
 0x99d   : > { %2148 = shalt.err (!%p2145_p6)
}
 0x99e   : > { %s2149_s17 = scalar_lea.hbm %s1593_s14, 128  ;;  %s2153_s26 = scalar_lea.hbm %s2787_s20, 256 }
 0x99f   : > { %p2150_p4 = scmp.ne.s32.totalorder %s1593_s14, %s2149_s17  ;;  %p2154_p11 = scmp.lt.s32.totalorder %s1593_s14, %s2787_s20 }
 0x9a0   : > { %p2155_p9 = scmp.lt.s32.totalorder %s2153_s26, %s2149_s17 }
 0x9a1   : > { %p2151_p8 = pnand %p2150_p4, %p2785_p10 }
 0x9a2   : > { %p2156_p7 = por %p2155_p9, %p2154_p11 }
 0x9a3   : > { %p2152_p13 = pneg %p2151_p8 }
 0x9a5   : > { %p2157_p1 = pnand %p2156_p7, %p2152_p13 }
 0x9a7   : > { %2160 = shalt.err (!%p2157_p1)
}
 0x9a8   : > { %1931 = dma.vmem_to_hbm [thread:$0]  (%p2785_p10), %s1596_s29, 128, %s1593_s14, %s1577_s27  }
 0x9a9 PF: > { %s2788_s21 = sld [smem:[#allocation16_spill]]  ;;  %p2791_p0 = scmp.ge.s32.totalorder %s2211_s24, 2 }
 0x9aa   : > { %s2789_s28 = sld [smem:[#allocation18_spill]] }
 0x9af   : > { %s1623_s12 = sand.u32 1, %s2788_s21  }
 0x9b0   : > { %p2790_p2 = scmp.ne.s32.totalorder %s2789_s28, 0  ;;  %s1624_s30 = scalar_lea.sflag [#allocation4], %s1623_s12 }
 0x9b2   : > { %p1947_p3 = pnand %p2791_p0, %p2790_p2 }
 0x9b4   : > { %p1948_p12 = pneg %p1947_p3 }
 0x9b6   : > { %2190 = dma.done.wait (%p1948_p12), %s1624_s30, 128  }
 0x9b7   : > { %2192 = vsyncadd (%p1948_p12), %s1624_s30, 4294967168  ;;  %s1633_s23 = scalar_lea.sflag [#allocation10], %s1623_s12 }
 0x9b8   : > { %2194 = dma.done.wait (%p1948_p12), %s1633_s23, 512  }
 0x9b9   : > { %2196 = vsyncadd (%p1948_p12), %s1633_s23, 4294966784  ;;  %s2792_s24 = sld [smem:[#allocation19_spill]]  ;;  %s2795_s21 = smov %s2203_s22 }
 0x9ba   : > { %s2793_s25 = sld [smem:[#allocation17_spill]] }
 0x9bb   : > { %s2794_s23 = sld [smem:[#allocation20_spill]] }
 0x9bf   : > { %p32_p10 = scmp.ge.s32.totalorder %s2792_s24, 4  }
 0x9c0   : > { %s2796_s22 = smov %s2793_s25 }
 0x9c1   :  { %34 = sbr.rel (!%p32_p10) target bundleno = 14 (0xe), region = 143 }
 0x9c6   :  { %1638 = vsyncpa [#allocation3], 1 }
 0x9c7   :  { %1640 = vsyncpa [#allocation3 + $0x1], 1 }
 0x9c8   :  { %1641 = vsyncpa [#allocation6], 1 }
 0x9c9   :  { %1643 = vsyncpa [#allocation6 + $0x1], 1 }
 0x9ca   :  { %1644 = vsyncpa [#allocation4], 1 }
 0x9cb   :  { %1646 = vsyncpa [#allocation4 + $0x1], 1 }
 0x9cc   :  { %1647 = vsyncpa [#allocation10], 1 }
 0x9cd   :  { %1649 = vsyncpa [#allocation10 + $0x1], 1 }

</bundles_post_ra>
